<compile_context>
chip_gen: v6e
topology: v6e:2x2x1
jax: 0.10.0
libtpu: 0.0.40
codegen_flags: <defaults>
</compile_context>

<pallas_src>
import math

import jax
import jax.numpy as jnp
from jax.experimental import pallas as pl
from jax.experimental.pallas import tpu as pltpu


def _round_up(x, m):
    return ((x + m - 1) // m) * m


# ----------------------------------------------------------------------------
# Fused kernel: tiled encoder matmul + AttentionHead epilogue.
#   grid = (M_tiles, K_tiles)
#     x_ref     : (tm, tk)    bf16   flattened-image tile
#     w_enc_ref : (tk, D)     bf16   frozen encoder weight tile
#     b_enc_ref : (1, D)      f32    encoder bias (resident, constant index_map)
#     wc_ref    : (D, C_pad)  f32    classifier weight (resident)
#     bc_ref    : (1, C_pad)  f32    classifier bias   (resident)
#     o_ref     : (tm, C_pad) f32    logits tile (lane-dense store)
#     acc_ref   : (tm, D)     f32    VMEM accumulator (features)
# ----------------------------------------------------------------------------
def _fused_kernel(x_ref, w_enc_ref, b_enc_ref, wc_ref, bc_ref, o_ref, acc_ref):
    k = pl.program_id(1)

    @pl.when(k == 0)
    def _init():
        acc_ref[...] = jnp.zeros_like(acc_ref)

    acc_ref[...] += jnp.dot(
        x_ref[...], w_enc_ref[...], preferred_element_type=jnp.float32
    )

    @pl.when(k == pl.num_programs(1) - 1)
    def _epilogue():
        # features = model.encode_image(x).float()
        features = acc_ref[...] + b_enc_ref[...]
        # AttentionHead: softmax over the unsqueezed size-1 axis == 1 exactly,
        # so attended_features == features; the attention MLP is a no-op on
        # the output and is intentionally not computed here.
        o_ref[...] = (
            jnp.dot(features, wc_ref[...], preferred_element_type=jnp.float32)
            + bc_ref[...]
        )


def clip_finetuner_with_attention_forward(x_nchw, params, *, tk=512, tm_max=256):
    B = x_nchw.shape[0]
    F = math.prod(x_nchw.shape[1:])
    D = params["w_enc"].shape[1]
    C = params["wc"].shape[1]

    # --- tile sizing / padding --------------------------------------------
    tk = min(tk, _round_up(F, 128))          # reduction tile (lane-aligned)
    F_pad = _round_up(F, tk)
    tm = min(_round_up(B, 8), tm_max)        # batch tile (sublane-aligned)
    B_pad = _round_up(_round_up(B, 8), tm)
    C_pad = _round_up(C, 128)                # lane-dense logits store

    # --- operand prep (glue, outside the kernel) ---------------------------
    # flatten NCHW row-major, cast to bf16 for the MXU, zero-pad to tiles.
    x_flat = x_nchw.reshape(B, F).astype(jnp.bfloat16)
    x_flat = jnp.pad(x_flat, ((0, B_pad - B), (0, F_pad - F)))
    w_enc = params["w_enc"].astype(jnp.bfloat16)
    w_enc = jnp.pad(w_enc, ((0, F_pad - F), (0, 0)))          # zero rows: no-op in matmul
    b_enc = params["b_enc"].astype(jnp.float32)               # (1, D)
    wc = jnp.pad(params["wc"].astype(jnp.float32), ((0, 0), (0, C_pad - C)))
    bc = jnp.pad(params["bc"].astype(jnp.float32), ((0, 0), (0, C_pad - C)))

    grid = (B_pad // tm, F_pad // tk)

    out = pl.pallas_call(
        _fused_kernel,
        out_shape=jax.ShapeDtypeStruct((B_pad, C_pad), jnp.float32),
        grid=grid,
        in_specs=[
            pl.BlockSpec((tm, tk), lambda i, k: (i, k)),      # x tile
            pl.BlockSpec((tk, D), lambda i, k: (k, 0)),       # w_enc tile
            pl.BlockSpec((1, D), lambda i, k: (0, 0)),        # b_enc (resident)
            pl.BlockSpec((D, C_pad), lambda i, k: (0, 0)),    # wc (resident)
            pl.BlockSpec((1, C_pad), lambda i, k: (0, 0)),    # bc (resident)
        ],
        out_specs=pl.BlockSpec((tm, C_pad), lambda i, k: (i, 0)),
        scratch_shapes=[pltpu.VMEM((tm, D), jnp.float32)],
        compiler_params=pltpu.CompilerParams(
            # batch tiles are independent (megacore on v7x); reduction is serial.
            dimension_semantics=("parallel", "arbitrary"),
            # explicit budget: tiles sized to fit comfortably on v7x (64 MiB VMEM)
            # as well as v5e/v6e (128 MiB).
            vmem_limit_bytes=32 * 1024 * 1024,
        ),
    )(x_flat, w_enc, b_enc, wc, bc)

    return out[:B, :C]


def init_params(key, in_flat, output_dim, num_classes):
    """Deterministic init. Weights stored as (in, out) == PyTorch Linear.weight.T.

    w1/b1/w2/b2 mirror AttentionHead.attention but (because softmax over the
    size-1 unsqueezed axis is identically 1) they never affect the forward
    output; they are kept only for module fidelity and the reference check.
    """
    ks = jax.random.split(key, 7)
    d2 = output_dim // 2
    scale = 0.02
    return {
        # frozen encoder stand-in (stored bf16: frozen weight, HBM-stream bound)
        "w_enc": (scale * jax.random.normal(ks[0], (in_flat, output_dim), jnp.float32)
                  ).astype(jnp.bfloat16),
        "b_enc": scale * jax.random.normal(ks[1], (1, output_dim), jnp.float32),
        # AttentionHead.attention[0]: Linear(output_dim, output_dim // 2)
        "w1": scale * jax.random.normal(ks[2], (output_dim, d2), jnp.float32),
        "b1": scale * jax.random.normal(ks[3], (1, d2), jnp.float32),
        # AttentionHead.attention[2]: Linear(output_dim // 2, 1)
        "w2": scale * jax.random.normal(ks[4], (d2, 1), jnp.float32),
        "b2": jnp.zeros((1, 1), jnp.float32),
        # AttentionHead.classifier: Linear(output_dim, num_classes)
        "wc": scale * jax.random.normal(ks[5], (output_dim, num_classes), jnp.float32),
        "bc": scale * jax.random.normal(ks[6], (1, num_classes), jnp.float32),
    }


if __name__ == "__main__":
    # Small shapes consistent with the module: image batch, 3-channel input,
    # output_dim (CLIP feature dim stand-in) 32, 8 classes.
    B, C_IN, H, W = 2, 3, 16, 16
    OUTPUT_DIM = 32
    NUM_CLASSES = 8

    key = jax.random.PRNGKey(0)
    k_x, k_p = jax.random.split(key)
    x = jax.random.normal(k_x, (B, C_IN, H, W), jnp.float32)   # NCHW, like PyTorch
    params = init_params(k_p, C_IN * H * W, OUTPUT_DIM, NUM_CLASSES)

    out = clip_finetuner_with_attention_forward(x, params)
    out = jax.block_until_ready(out)
    assert out.shape == (B, NUM_CLASSES) and out.dtype == jnp.float32

    # Pure-JAX reference of the FULL PyTorch math (including the attention MLP
    # and the softmax over the size-1 axis), using the same bf16 encoder operands.
    x_flat = x.reshape(B, -1)
    f_ref = (x_flat.astype(jnp.bfloat16).astype(jnp.float32)
             @ params["w_enc"].astype(jnp.float32)) + params["b_enc"]
    h_ref = jnp.tanh(f_ref @ params["w1"] + params["b1"])
    s_ref = h_ref @ params["w2"] + params["b2"]
    attn_ref = jax.nn.softmax(s_ref[:, None, :], axis=1)       # softmax over size-1 dim == 1
    att_ref = jnp.sum(attn_ref * f_ref[:, None, :], axis=1)
    ref = att_ref @ params["wc"] + params["bc"]

    assert jnp.allclose(out, ref, atol=1e-2, rtol=1e-2), (
        "max abs err:", float(jnp.max(jnp.abs(out - ref))))

    print("KERNEL_OK")
</pallas_src>

<mosaic_0001>
module attributes {stable_mosaic.version = 11 : i64} {
  func.func @_fused_kernel(%arg0: i32, %arg1: i32, %arg2: memref<8x512xbf16, #tpu.memory_space<vmem>>, %arg3: memref<512x32xbf16, #tpu.memory_space<vmem>>, %arg4: memref<1x32xf32, #tpu.memory_space<vmem>>, %arg5: memref<32x128xf32, #tpu.memory_space<vmem>>, %arg6: memref<1x128xf32, #tpu.memory_space<vmem>>, %arg7: memref<8x128xf32, #tpu.memory_space<vmem>>, %arg8: memref<8x32xf32, #tpu.memory_space<vmem>>) attributes {dimension_semantics = [#tpu.dimension_semantics<parallel>, #tpu.dimension_semantics<arbitrary>], iteration_bounds = array<i64: 1, 2>, scalar_prefetch = 0 : i64, scratch_operands = 1 : i64, tpu.core_type = #tpu.core_type<tc>, window_params = [{transform_indices = @transform_0, window_bounds = array<i64: 8, 512>}, {transform_indices = @transform_1, window_bounds = array<i64: 512, 32>}, {pipeline_mode = #tpu.pipeline_mode<synchronous>, transform_indices = @transform_2, window_bounds = array<i64: 1, 32>}, {pipeline_mode = #tpu.pipeline_mode<synchronous>, transform_indices = @transform_3, window_bounds = array<i64: 32, 128>}, {pipeline_mode = #tpu.pipeline_mode<synchronous>, transform_indices = @transform_4, window_bounds = array<i64: 1, 128>}, {transform_indices = @transform_5, window_bounds = array<i64: 8, 128>}]} {
    %c0_i32 = arith.constant 0 : i32
    %0 = arith.cmpi eq, %arg1, %c0_i32 : i32
    %1 = arith.extui %0 : i1 to i32
    %c0_i32_0 = arith.constant 0 : i32
    %2 = arith.cmpi ne, %1, %c0_i32_0 : i32
    scf.if %2 {
      %cst_9 = arith.constant 0.000000e+00 : f32
      %12 = vector.broadcast %cst_9 : f32 to vector<8x32xf32>
      %c0_10 = arith.constant 0 : index
      %c0_11 = arith.constant 0 : index
      %13 = vector.load %arg8[%c0_10, %c0_11] : memref<8x32xf32, #tpu.memory_space<vmem>>, vector<8x32xf32>
      tpu.vector_store %arg8[%c0_10, %c0_11], %12 {strides = array<i32>} : memref<8x32xf32, #tpu.memory_space<vmem>>, vector<8x32xf32>,
    } else {
    }
    %c0 = arith.constant 0 : index
    %c0_1 = arith.constant 0 : index
    %3 = vector.load %arg8[%c0, %c0_1] : memref<8x32xf32, #tpu.memory_space<vmem>>, vector<8x32xf32>
    %c0_2 = arith.constant 0 : index
    %c0_3 = arith.constant 0 : index
    %4 = vector.load %arg2[%c0_2, %c0_3] : memref<8x512xbf16, #tpu.memory_space<vmem>>, vector<8x512xbf16>
    %c0_4 = arith.constant 0 : index
    %c0_5 = arith.constant 0 : index
    %5 = vector.load %arg3[%c0_4, %c0_5] : memref<512x32xbf16, #tpu.memory_space<vmem>>, vector<512x32xbf16>
    %cst = arith.constant dense<0.000000e+00> : vector<8x32xf32>
    %6 = tpu.matmul %4, %5, %cst {dimension_numbers = #tpu.dot_dimension_numbers<[1], [0], [0], [1], [0, 0, 1, 1], [], []>} : vector<8x512xbf16>, vector<512x32xbf16>, vector<8x32xf32> -> vector<8x32xf32>
    %7 = arith.addf %3, %6 : vector<8x32xf32>
    %c0_6 = arith.constant 0 : index
    %c0_7 = arith.constant 0 : index
    %8 = vector.load %arg8[%c0_6, %c0_7] : memref<8x32xf32, #tpu.memory_space<vmem>>, vector<8x32xf32>
    tpu.vector_store %arg8[%c0_6, %c0_7], %7 {strides = array<i32>} : memref<8x32xf32, #tpu.memory_space<vmem>>, vector<8x32xf32>,
    %c1_i32 = arith.constant 1 : i32
    %9 = arith.cmpi eq, %arg1, %c1_i32 : i32
    %10 = arith.extui %9 : i1 to i32
    %c0_i32_8 = arith.constant 0 : i32
    %11 = arith.cmpi ne, %10, %c0_i32_8 : i32
    scf.if %11 {
      %c0_9 = arith.constant 0 : index
      %c0_10 = arith.constant 0 : index
      %12 = vector.load %arg8[%c0_9, %c0_10] : memref<8x32xf32, #tpu.memory_space<vmem>>, vector<8x32xf32>
      %c0_11 = arith.constant 0 : index
      %c0_12 = arith.constant 0 : index
      %13 = vector.load %arg4[%c0_11, %c0_12] : memref<1x32xf32, #tpu.memory_space<vmem>>, vector<1x32xf32>
      %14 = vector.broadcast %13 : vector<1x32xf32> to vector<8x32xf32>
      %15 = arith.addf %12, %14 : vector<8x32xf32>
      %c0_13 = arith.constant 0 : index
      %c0_14 = arith.constant 0 : index
      %16 = vector.load %arg5[%c0_13, %c0_14] : memref<32x128xf32, #tpu.memory_space<vmem>>, vector<32x128xf32>
      %cst_15 = arith.constant dense<0.000000e+00> : vector<8x128xf32>
      %17 = tpu.matmul %15, %16, %cst_15 {dimension_numbers = #tpu.dot_dimension_numbers<[1], [0], [0], [1], [0, 0, 1, 1], [], []>} : vector<8x32xf32>, vector<32x128xf32>, vector<8x128xf32> -> vector<8x128xf32>
      %c0_16 = arith.constant 0 : index
      %c0_17 = arith.constant 0 : index
      %18 = vector.load %arg6[%c0_16, %c0_17] : memref<1x128xf32, #tpu.memory_space<vmem>>, vector<1x128xf32>
      %19 = vector.broadcast %18 : vector<1x128xf32> to vector<8x128xf32>
      %20 = arith.addf %17, %19 : vector<8x128xf32>
      %c0_18 = arith.constant 0 : index
      %c0_19 = arith.constant 0 : index
      %21 = vector.load %arg7[%c0_18, %c0_19] : memref<8x128xf32, #tpu.memory_space<vmem>>, vector<8x128xf32>
      tpu.vector_store %arg7[%c0_18, %c0_19], %20 {strides = array<i32>} : memref<8x128xf32, #tpu.memory_space<vmem>>, vector<8x128xf32>,
    } else {
    }
    return
  }
  func.func @transform_0(%arg0: i32, %arg1: i32) -> (i32, i32) {
    %c0_i32 = arith.constant 0 : i32
    return %arg0, %arg1 : i32, i32
  }
  func.func @transform_1(%arg0: i32, %arg1: i32) -> (i32, i32) {
    %c0_i32 = arith.constant 0 : i32
    %c0_i32_0 = arith.constant 0 : i32
    return %arg1, %c0_i32 : i32, i32
  }
  func.func @transform_2(%arg0: i32, %arg1: i32) -> (i32, i32) {
    %c0_i32 = arith.constant 0 : i32
    %c0_i32_0 = arith.constant 0 : i32
    %c0_i32_1 = arith.constant 0 : i32
    return %c0_i32, %c0_i32_0 : i32, i32
  }
  func.func @transform_3(%arg0: i32, %arg1: i32) -> (i32, i32) {
    %c0_i32 = arith.constant 0 : i32
    %c0_i32_0 = arith.constant 0 : i32
    %c0_i32_1 = arith.constant 0 : i32
    return %c0_i32, %c0_i32_0 : i32, i32
  }
  func.func @transform_4(%arg0: i32, %arg1: i32) -> (i32, i32) {
    %c0_i32 = arith.constant 0 : i32
    %c0_i32_0 = arith.constant 0 : i32
    %c0_i32_1 = arith.constant 0 : i32
    return %c0_i32, %c0_i32_0 : i32, i32
  }
  func.func @transform_5(%arg0: i32, %arg1: i32) -> (i32, i32) {
    %c0_i32 = arith.constant 0 : i32
    %c0_i32_0 = arith.constant 0 : i32
    return %arg0, %c0_i32 : i32, i32
  }
}

</mosaic_0001>

<bundles_post_ra>
// kernel: tpu_custom_call.1
= control target key start
LH: loop header
LB: loop body
LE: loop exit
PB: predicated region body
PF: predicated region fallthrough
CT: control target
= control target key end

     0   :  { %10 = vsyncpa [#allocation4], 0  ;;  %s1073_s18 = smov 0   ;;  %s1075_s19 = smov 0   ;;  %s1188_s0 = inlined_call_operand.vmem [shape: bf16[8,1024], index: 0, kind: input, shape index: {}]   ;;  %s1189_s1 = inlined_call_operand.vmem [shape: bf16[1024,32], index: 1, kind: input, shape index: {}]   ;;  %s1190_s2 = inlined_call_operand.vmem [shape: f32[1,32], index: 2, kind: input, shape index: {}]   ;;  %s1191_s3 = inlined_call_operand.vmem [shape: f32[32,128], index: 3, kind: input, shape index: {}]   ;;  %s1192_s4 = inlined_call_operand.vmem [shape: f32[1,128], index: 4, kind: input, shape index: {}]   ;;  %s1193_s5 = inlined_call_operand.hbm [shape: f32[8,128], index: 5, kind: output, shape index: {}]  }
   0x1   :  { %s1077_s20 = smov 0  }
   0x2 LB: > { %s804_s21 = sadd.s32 4294967295, %s1037_s20   ;;  %s25_s22 = sadd.s32 1, %s1033_s19  ;;  %s1037_s20 = sphi %s1077_s20, %s16_s20   ;;  %s1033_s19 = sphi %s1075_s19, %s1196_s19   ;;  %s1029_s18 = sphi %s1073_s18, %s1195_s18  }
   0x3   : > { %p26_p0 = scmp.ge.s32.totalorder %s25_s22, 2  ;;  %p807_p1 = scmp.ge.s32.totalorder %s1037_s20, 1 }
   0x4   : > { %p218_p2 = scmp.lt.s32.totalorder %s1037_s20, 3 }
   0x5   : > { %s1198_s22 = smov (%p26_p0, %s25_s22), 0 }
   0x6   : > { %p219_p3 = pnand %p807_p1, %p218_p2 }
   0x7   : > { %s808_s23 = sshll.u32 (!%p219_p3), %s1029_s18, 2  ;;  %s810_s24 = sshll.u32 (!%p219_p3), %s1029_s18, 6 }
   0x8   : > { %222 = sbr.rel (%p219_p3) target bundleno = 480 (0x1e0), region = 40  ;;  %p253_p4 = scmp.lt.s32.totalorder (!%p219_p3), %s808_s23, 7 }
   0x9   : > { %p261_p5 = scmp.lt.s32.totalorder (!%p219_p3), %s810_s24, 127  ;;  %p812_p6 = scmp.ne.s32.totalorder (!%p219_p3), %s1029_s18, 0 }
   0xd   : > { %s1200_s23 = smov (!%p253_p4, %s808_s23), 7  ;;  %s1202_s24 = smov (!%p261_p5, %s810_s24), 127 }
   0xe   : > { %s809_s25 = sshll.u32 %s1200_s23, 2  ;;  %s811_s29 = sshll.u32 %s1202_s24, 2 }
   0xf   : > { %s1099_s28 = scalar_lea.vmem %s1188_s0, %s809_s25  ;;  %s1104_s7 = scalar_lea.vmem %s1189_s1, %s811_s29 }
  0x10   : > { %270 = sbr.rel (%p812_p6) target bundleno = 23 (0x17), region = 44 }
  0x15   : > { %vm271_vm0 = vcmask 261120   ;;  %v1039_v0 = vmov 0.0  }
  0x16   : > { %272 = vst.msk [vmem:[#allocation2] sm:$0xff] %vm271_vm0, %v1039_v0 }
  0x17 PF: > { %v951_v1 = vld [vmem:[%s1104_s7 + $0x78] sm:$0xff]   ;;  %v955_v5 = vld [vmem:[%s1104_s7 + $0x70] sm:$0xff]   ;;  %v959_v9 = vld [vmem:[%s1104_s7 + $0x68] sm:$0xff]   ;;  %vm627_vm1 = vcmask 261120   ;;  %p849_p7 = scmp.ne.s32.totalorder %s1029_s18, 1 }
  0x18   : > { %v952_v2 = vld [vmem:[%s1104_s7 + $0xf8] sm:$0xff]   ;;  %857 = vmatprep.subr.bf16.mxu0 %v951_v1  ;;  %v956_v6 = vld [vmem:[%s1104_s7 + $0xf0] sm:$0xff]   ;;  %v960_v10 = vld [vmem:[%s1104_s7 + $0xe8] sm:$0xff]  }
  0x19   : > { %v953_v3 = vld [vmem:[%s1104_s7 + $0x38] sm:$0xff]   ;;  %879 = vmatprep.subr.bf16.mxu1 %v952_v2  ;;  %v957_v7 = vld [vmem:[%s1104_s7 + $0x30] sm:$0xff]   ;;  %v961_v11 = vld [vmem:[%s1104_s7 + $0x28] sm:$0xff]  }
  0x1a   : > { %v954_v4 = vld [vmem:[%s1104_s7 + $0xb8] sm:$0xff]   ;;  %858 = vmatpush3.bf16.msra.mxu0 %v953_v3  ;;  %v958_v8 = vld [vmem:[%s1104_s7 + $0xb0] sm:$0xff]   ;;  %v962_v12 = vld [vmem:[%s1104_s7 + $0xa8] sm:$0xff]  }
  0x1b   : > { %880 = vmatpush3.bf16.msra.mxu1 %v954_v4  ;;  %859 = vmatprep.subr.bf16.mxu0 %v955_v5  ;;  %v963_v13 = vld [vmem:[%s1104_s7 + $0x60] sm:$0xff]   ;;  %v967_v17 = vld [vmem:[%s1104_s7 + $0x58] sm:$0xff]   ;;  %v971_v21 = vld [vmem:[%s1104_s7 + $0x50] sm:$0xff]  }
  0x1c   : > { %881 = vmatprep.subr.bf16.mxu1 %v956_v6  ;;  %v964_v14 = vld [vmem:[%s1104_s7 + $0xe0] sm:$0xff]   ;;  %v968_v18 = vld [vmem:[%s1104_s7 + $0xd8] sm:$0xff]   ;;  %v972_v22 = vld [vmem:[%s1104_s7 + $0xd0] sm:$0xff]  }
  0x1d   : > { %v965_v15 = vld [vmem:[%s1104_s7 + $0x20] sm:$0xff]   ;;  %v969_v19 = vld [vmem:[%s1104_s7 + $0x18] sm:$0xff]   ;;  %v973_v23 = vld [vmem:[%s1104_s7 + $0x10] sm:$0xff]  }
  0x1e   : > { %860 = vmatpush3.bf16.msra.mxu0 %v957_v7  ;;  %v966_v16 = vld [vmem:[%s1104_s7 + $0xa0] sm:$0xff]   ;;  %v970_v20 = vld [vmem:[%s1104_s7 + $0x98] sm:$0xff]   ;;  %v974_v24 = vld [vmem:[%s1104_s7 + $0x90] sm:$0xff]  }
  0x1f   : > { %882 = vmatpush3.bf16.msra.mxu1 %v958_v8  ;;  %861 = vmatprep.subr.bf16.mxu0 %v959_v9  ;;  %v975_v25 = vld [vmem:[%s1104_s7 + $0x48] sm:$0xff]   ;;  %v979_v29 = vld [vmem:[%s1104_s7 + $0x40] sm:$0xff]  }
  0x20   : > { %883 = vmatprep.subr.bf16.mxu1 %v960_v10  ;;  %v976_v26 = vld [vmem:[%s1104_s7 + $0xc8] sm:$0xff]   ;;  %v980_v30 = vld [vmem:[%s1104_s7 + $0xc0] sm:$0xff]  }
  0x21   : > { %v977_v27 = vld [vmem:[%s1104_s7 + $0x8] sm:$0xff]   ;;  %v981_v31 = vld [vmem:[%s1104_s7] sm:$0xff]  }
  0x22   : > { %862 = vmatpush3.bf16.msra.mxu0 %v961_v11  ;;  %v978_v28 = vld [vmem:[%s1104_s7 + $0x88] sm:$0xff]   ;;  %v982_v32 = vld [vmem:[%s1104_s7 + $0x80] sm:$0xff]  }
  0x23   : > { %884 = vmatpush3.bf16.msra.mxu1 %v962_v12  ;;  %863 = vmatprep.subr.bf16.mxu0 %v963_v13  ;;  %v274_v33 = vld [vmem:[%s1099_s28] sm:$0xff]  ;;  %v275_v34 = vld [vmem:[%s1099_s28 + $0x8] sm:$0xff] }
  0x24   : > { %885 = vmatprep.subr.bf16.mxu1 %v964_v14  ;;  %v813_v35 = vcombine.low %v274_v33, %v274_v33  ;;  %v814_v36 = vcombine.high %v274_v33, %v274_v33  ;;  %v815_v37 = vcombine.low %v275_v34, %v275_v34  ;;  %v816_v38 = vcombine.high %v275_v34, %v275_v34  ;;  %v273_v45 = vld [vmem:[#allocation2] sm:$0xff] }
  0x26   : > { %864 = vmatpush3.bf16.msra.mxu0 %v965_v15  ;;  %578 = vmatprep.mubr.bf16.mxu0 %v814_v36 }
  0x27   : > { %886 = vmatpush3.bf16.msra.mxu1 %v966_v16  ;;  %865 = vmatprep.subr.bf16.mxu0 %v967_v17 }
  0x28   : > { %887 = vmatprep.subr.bf16.mxu1 %v968_v18  ;;  %618 = vmatprep.mubr.bf16.mxu1 %v816_v38 }
  0x2a   : > { %866 = vmatpush3.bf16.msra.mxu0 %v969_v19 }
  0x2b   : > { %888 = vmatpush3.bf16.msra.mxu1 %v970_v20  ;;  %867 = vmatprep.subr.bf16.mxu0 %v971_v21 }
  0x2c   : > { %889 = vmatprep.subr.bf16.mxu1 %v972_v22 }
  0x2e   : > { %868 = vmatpush3.bf16.msra.mxu0 %v973_v23 }
  0x2f   : > { %890 = vmatpush3.bf16.msra.mxu1 %v974_v24  ;;  %869 = vmatprep.subr.bf16.mxu0 %v975_v25 }
  0x30   : > { %891 = vmatprep.subr.bf16.mxu1 %v976_v26 }
  0x32   : > { %870 = vmatpush3.bf16.msra.mxu0 %v977_v27 }
  0x33   : > { %892 = vmatpush3.bf16.msra.mxu1 %v978_v28  ;;  %871 = vmatprep.subr.bf16.mxu0 %v979_v29 }
  0x34   : > { %893 = vmatprep.subr.bf16.mxu1 %v980_v30 }
  0x36   : > { %872 = vmatpush3.bf16.msra.mxu0 %v981_v31 }
  0x37   : > { %894 = vmatpush3.bf16.msra.mxu1 %v982_v32 }
  0x39   : > { %579 = vmatmul.mubr.bf16.vlgmr.msra.gmra.mxu0 %v813_v35 }
  0x3a   : > { %619 = vmatmul.mubr.bf16.vlgmr.msra.gmra.mxu1 %v815_v37 }
  0xf9   : > { %v873_v39 = vpop.f32.mrf.mxu0 }
  0xfa   : > { %v895_v40 = vpop.f32.mrf.mxu1 }
  0xfb   : > { %v874_v41 = vpop.f32.mrf.mxu0 }
  0xfc   : > { %v896_v42 = vpop.f32.mrf.mxu1  ;;  %v875_v43 = vadd.f32 %v874_v41, %v873_v39 }
  0xfd   : > { %v897_v44 = vadd.f32 %v896_v42, %v895_v40  ;;  %v876_v46 = vpop.f32.mrf.mxu0 }
  0xfe   : > { %v898_v47 = vpop.f32.mrf.mxu1 }
  0xff   : > { %v621_v48 = vadd.f32 %v897_v44, %v875_v43  ;;  %v877_v49 = vpop.f32.mrf.mxu0  ;;  %632 = sbr.rel (%p849_p7) target bundleno = 465 (0x1d1), region = 48 }
 0x100   : > { %v899_v50 = vpop.f32.mrf.mxu1 }
 0x101   : > { %v626_v51 = vadd.f32 %v621_v48, %v273_v45 }
 0x103   : > { %628 = vst.msk [vmem:[#allocation2] sm:$0xff] %vm627_vm1, %v626_v51 }
 0x104   : > { %v645_v52 = vld [vmem:[%s1191_s3 + $0x18] sm:$0xff]  ;;  %v1040_v53 = vmov 0.0   ;;  %v644_v54 = vld [vmem:[%s1191_s3 + $0x10] sm:$0xff]  ;;  %vm1041_vm2 = vmmov 0   ;;  %v850_v56 = vld [vmem:[%s1190_s2] ss:$0 sm:$0xff] }
 0x105   : > { %906 = vmatprep.subr.mxu0 %v1040_v53  ;;  %914 = vmatprep.mubr.msk.f32.mxu0 %vm1041_vm2, %v1040_v53  ;;  %v643_v57 = vld [vmem:[%s1191_s3 + $0x8] sm:$0xff]  ;;  %v642_v58 = vld [vmem:[%s1191_s3] sm:$0xff] }
 0x106   : > { %907 = vmatpush3.msra.mxu0 %v645_v52  ;;  %v851_v60 = vld [vmem:[%s1192_s4] ss:$0 sm:$0xff] }
 0x107   : > { %908 = vmatprep.subr.mxu0 %v1040_v53 }
 0x108   : > { %909 = vmatpush3.msra.mxu0 %v644_v54 }
 0x109   : > { %910 = vmatprep.subr.mxu0 %v1040_v53 }
 0x10a   : > { %v633_v55 = vld [vmem:[#allocation2] sm:$0xff]  ;;  %911 = vmatpush3.msra.mxu0 %v643_v57 }
 0x10b   : > { %v641_v59 = vadd.f32 %v850_v56, %v633_v55  ;;  %912 = vmatprep.subr.mxu0 %v1040_v53 }
 0x10c   : > { %913 = vmatpush3.msra.mxu0 %v642_v58 }
 0x10d   : > { %915 = vmatmul.mubr.msk.f32.vlgmr.msra.gmra.mxu0 %vm627_vm1, %v641_v59 }
 0x1cd   : > { %v722_v61 = vpop.f32.mrf.mxu0 }
 0x1ce   : > { %v723_v62 = vadd.f32 %v851_v60, %v722_v61 }
 0x1cf   : > { %v916_v63 = vpop.f32.mrf.mxu0 }
 0x1d0   : > { %726 = vst [vmem:[#allocation3] sm:$0xff] %v723_v62 }
 0x1d1 PF: > { %p1164_p8 = scmp.eq.s32.totalorder %s804_s21, 1  ;;  %s1042_s25 = smov [#allocation3]  }
 0x1d2   : > { %s736_s26 = sshll.u32 %s1042_s25, 4  ;;  %s737_s26 = int_to_ptr.vmem [resolvable:$true] %s736_s26 }
 0x1d3   : > { %s987_s27 = scalar_lea.vmem %s737_s26, 128  ;;  %p994_p12 = scmp.lt.s32.totalorder %s737_s26, %s737_s26 }
 0x1d4   : > { %p988_p9 = scmp.ne.s32.totalorder %s737_s26, %s987_s27  ;;  %p995_p13 = scmp.lt.s32.totalorder %s987_s27, %s987_s27 }
 0x1d6   : > { %p989_p10 = pnand %p988_p9, %p1164_p8  ;;  %p996_p0 = por %p995_p13, %p994_p12 }
 0x1d8   : > { %p990_p11 = pneg %p989_p10 }
 0x1da   : > { %p997_p1 = pnand %p996_p0, %p990_p11 }
 0x1dc   : > { %1000 = shalt.err (!%p997_p1)
}
 0x1dd   : > { %918 = dma.vmem_to_hbm [thread:$0]  (%p1164_p8), %s737_s26, 128, %s1193_s5, [#allocation4]  }
 0x1de   : > { %1024 = dma.done.wait (%p1164_p8), [#allocation4], 128  }
 0x1df   : > { %1026 = vsyncadd (%p1164_p8), [#allocation4], 4294967168 }
 0x1e0 PF: > { %s16_s20 = sadd.s32 1, %s1037_s20   ;;  %s1195_s18 = smov %s1033_s19 }
 0x1e1   : > { %p13_p2 = scmp.ge.s32.totalorder %s16_s20, 4   ;;  %s1196_s19 = smov %s1198_s22 }
 0x1e3   :  { %15 = sbr.rel (!%p13_p2) target bundleno = 2 (0x2), region = 79 }
 0x1e8   :  { %749 = vsyncpa [#allocation4], 1 }
 0x1e9   :  { %751 = vsyncpa [#allocation4 + $0x1], 1 }

</bundles_post_ra>
